<compile_context>
chip_gen: v5e
topology: v5e:2x2
jax: 0.10.0
libtpu: 0.0.40
codegen_flags: <defaults>
</compile_context>

<pallas_src>
import functools
import math

import jax
import jax.numpy as jnp
from jax.experimental import pallas as pl
from jax.experimental.pallas import tpu as pltpu


_NEG_BIG = -1000000000.0  # matches the PyTorch masked_fill value
_MiB = 1024 * 1024


def _round_up(x, m):
    return ((x + m - 1) // m) * m


def _pad_to(x, shape):
    pads = tuple((0, t - s) for s, t in zip(x.shape, shape))
    if any(p[1] for p in pads):
        return jnp.pad(x, pads)
    return x


def _vmem_capacity_bytes():
    """Physical VMEM per TensorCore (generation-aware, with safe fallbacks)."""
    try:
        return int(pltpu.get_tpu_info().vmem_capacity_bytes)
    except Exception:
        pass
    try:
        kind = jax.devices()[0].device_kind.lower()
    except Exception:
        kind = ""
    if "v7" in kind or "7x" in kind:
        return 64 * _MiB           # v7x: 64 MiB per TensorCore
    if "v5" in kind or "v6" in kind:
        return 128 * _MiB          # v5e / v6e: 128 MiB
    return 64 * _MiB               # unknown: stay conservative


# ---------------------------------------------------------------------------
# Kernels
# ---------------------------------------------------------------------------
def _attention_single_kernel(q_ref, k_ref, v_ref, bias_ref, o_ref, *,
                             scale, compute_dtype):
    """Fast path: all keys fit in one tile -> one-pass softmax, no scratch."""
    q = (q_ref[...].astype(jnp.float32) * scale).astype(compute_dtype)
    s = jnp.einsum("bqd,bkd->bqk", q, k_ref[...].astype(compute_dtype),
                   preferred_element_type=jnp.float32)
    s = s + bias_ref[...]                              # additive mask bias (B,1,K)
    m = jnp.max(s, axis=-1, keepdims=True)
    p = jnp.exp(s - m)
    l = jnp.sum(p, axis=-1, keepdims=True)
    r = pl.reciprocal(l, approx=True)                  # EUP vrcp (free slot)
    r = r * (2.0 - l * r)                              # one Newton step
    o = jnp.einsum("bqk,bkd->bqd", p.astype(compute_dtype),
                   v_ref[...].astype(compute_dtype),
                   preferred_element_type=jnp.float32)
    o_ref[...] = (o * r).astype(o_ref.dtype)


def _attention_flash_kernel(q_ref, k_ref, v_ref, bias_ref, o_ref,
                            qs_sc, m_sc, l_sc, acc_sc, *,
                            scale, compute_dtype):
    """Multi k-tile path: streaming (online) softmax over the ki grid axis."""
    ki = pl.program_id(2)

    @pl.when(ki == 0)
    def _init():
        # q block is revisited across the k axis: scale it once (in f32) and
        # cache it in the MXU compute dtype instead of rescaling every k step.
        qs_sc[...] = (q_ref[...].astype(jnp.float32) * scale).astype(compute_dtype)
        m_sc[...] = jnp.full_like(m_sc, -jnp.inf)
        l_sc[...] = jnp.zeros_like(l_sc)
        acc_sc[...] = jnp.zeros_like(acc_sc)

    s = jnp.einsum("bqd,bkd->bqk", qs_sc[...], k_ref[...].astype(compute_dtype),
                   preferred_element_type=jnp.float32)     # (B, tq, tk) f32
    s = s + bias_ref[...]

    m_prev = m_sc[...]
    m_new = jnp.maximum(m_prev, jnp.max(s, axis=-1, keepdims=True))
    alpha = jnp.exp(m_prev - m_new)
    # TODO(synk): on v6e/v7x (bf16 EUP) computing exp in bf16 relieves the single
    #             EUP slot; kept in f32 here for v5e compatibility and tighter numerics.
    p = jnp.exp(s - m_new)
    l_sc[...] = alpha * l_sc[...] + jnp.sum(p, axis=-1, keepdims=True)
    acc_sc[...] = alpha * acc_sc[...] + jnp.einsum(
        "bqk,bkd->bqd", p.astype(compute_dtype), v_ref[...].astype(compute_dtype),
        preferred_element_type=jnp.float32)
    m_sc[...] = m_new

    @pl.when(ki == pl.num_programs(2) - 1)
    def _finalize():
        l = l_sc[...]
        r = pl.reciprocal(l, approx=True)
        r = r * (2.0 - l * r)
        o_ref[...] = (acc_sc[...] * r).astype(o_ref.dtype)


# ---------------------------------------------------------------------------
# Wrapper
# ---------------------------------------------------------------------------
def dot_product_attention(q, k, v, mask=None, *, use_bf16_matmul=True):
    """Pallas eval-mode forward of DotProductAttention.

    q: (bz, q_len, d)  k: (bz, k_len, d)  v: (bz, k_len, d)
    mask: optional (bz, k_len), nonzero = keep.  Returns (bz, q_len, d).
    """
    bz, q_len, q_dim = q.shape
    _, k_len, k_dim = k.shape
    _, v_len, v_dim = v.shape
    assert k_len == v_len and v_dim == q_dim and k_dim == q_dim

    scale = 1.0 / math.sqrt(k_dim)
    out_dtype = q.dtype
    compute_dtype = jnp.bfloat16 if use_bf16_matmul else q.dtype

    # Keep the native head dim: block last dim == full array dim is legal and
    # avoids 4x HBM inflation (plus an extra pad copy) for small d (worst on v5e).
    d = q_dim

    # ---- tile sizes -----------------------------------------------------------
    tq = min(_round_up(q_len, 8), 512)            # sublane multiple
    tk = min(_round_up(k_len, 128), 512)          # lane multiple (score last dim)
    q_len_p = _round_up(q_len, tq)
    k_len_p = _round_up(k_len, tk)
    num_q_tiles = q_len_p // tq
    num_k_tiles = k_len_p // tk
    multi = num_k_tiles > 1

    # ---- generation-aware VMEM budgeting --------------------------------------
    vmem_cap = _vmem_capacity_bytes()
    vmem_budget = (3 * vmem_cap) // 8             # 48 MiB v5e/v6e, 24 MiB v7x

    in_bytes = jnp.dtype(q.dtype).itemsize        # dtype-aware (bf16 vs f32 inputs)
    comp_bytes = jnp.dtype(compute_dtype).itemsize
    per_batch = (2 * tq * d * in_bytes            # q   (double-buffered)
                 + 2 * 2 * tk * d * in_bytes      # k+v (double-buffered)
                 + 2 * tk * 4                     # bias (double-buffered, f32)
                 + 2 * tq * d * in_bytes)         # out (double-buffered)
    if multi:
        per_batch += tq * d * (4 + comp_bytes) + 2 * tq * 4   # acc + q*scale + m,l

    b_blk = int(max(1, min(bz, vmem_budget // per_batch)))
    # Feed both TensorCores (v7x) when there is only one q tile: keep the product
    # of the "parallel" grid extents >= 2 (negligible cost on single-TC chips).
    if num_q_tiles == 1 and bz >= 2:
        b_blk = min(b_blk, max(1, bz // 2))
    bz_p = _round_up(bz, b_blk)

    vmem_limit = int(min(vmem_cap - 8 * _MiB,
                         max((3 * vmem_cap) // 4, b_blk * per_batch + 16 * _MiB)))

    # ---- padding (batch / sequence only; head dim stays native) ---------------
    qp = _pad_to(q, (bz_p, q_len_p, d))
    kp = _pad_to(k, (bz_p, k_len_p, d))
    vp = _pad_to(v, (bz_p, k_len_p, d))

    if mask is None:
        valid = jnp.ones((bz, k_len), dtype=bool)
    else:
        valid = mask.astype(bool)
    valid = jnp.pad(valid, ((0, bz_p - bz), (0, k_len_p - k_len)),
                    constant_values=False)
    bias = jnp.where(valid, 0.0, _NEG_BIG).astype(jnp.float32)[:, None, :]

    cost = pl.CostEstimate(
        flops=4 * bz * q_len * k_len * d,
        transcendentals=bz * q_len * k_len,
        bytes_accessed=int(in_bytes * (q.size + k.size + v.size + bz * q_len * d)
                           + 4 * bz * k_len))

    if multi:
        grid = (bz_p // b_blk, num_q_tiles, num_k_tiles)
        grid_spec = pltpu.PrefetchScalarGridSpec(
            num_scalar_prefetch=0,
            grid=grid,
            in_specs=[
                pl.BlockSpec((b_blk, tq, d), lambda b, qi, ki: (b, qi, 0)),
                pl.BlockSpec((b_blk, tk, d), lambda b, qi, ki: (b, ki, 0)),
                pl.BlockSpec((b_blk, tk, d), lambda b, qi, ki: (b, ki, 0)),
                pl.BlockSpec((b_blk, 1, tk), lambda b, qi, ki: (b, 0, ki)),
            ],
            out_specs=pl.BlockSpec((b_blk, tq, d), lambda b, qi, ki: (b, qi, 0)),
            scratch_shapes=[
                pltpu.VMEM((b_blk, tq, d), compute_dtype),   # cached q * scale
                pltpu.VMEM((b_blk, tq, 1), jnp.float32),     # running max   m
                pltpu.VMEM((b_blk, tq, 1), jnp.float32),     # running denom l
                pltpu.VMEM((b_blk, tq, d), jnp.float32),     # running numerator
            ],
        )
        kernel = functools.partial(_attention_flash_kernel, scale=scale,
                                   compute_dtype=compute_dtype)
        dims = ("parallel", "parallel", "arbitrary")
    else:
        grid = (bz_p // b_blk, num_q_tiles)
        grid_spec = pltpu.PrefetchScalarGridSpec(
            num_scalar_prefetch=0,
            grid=grid,
            in_specs=[
                pl.BlockSpec((b_blk, tq, d), lambda b, qi: (b, qi, 0)),
                pl.BlockSpec((b_blk, k_len_p, d), lambda b, qi: (b, 0, 0)),
                pl.BlockSpec((b_blk, k_len_p, d), lambda b, qi: (b, 0, 0)),
                pl.BlockSpec((b_blk, 1, k_len_p), lambda b, qi: (b, 0, 0)),
            ],
            out_specs=pl.BlockSpec((b_blk, tq, d), lambda b, qi: (b, qi, 0)),
        )
        kernel = functools.partial(_attention_single_kernel, scale=scale,
                                   compute_dtype=compute_dtype)
        dims = ("parallel", "parallel")

    out = pl.pallas_call(
        kernel,
        out_shape=jax.ShapeDtypeStruct((bz_p, q_len_p, d), out_dtype),
        grid_spec=grid_spec,
        compiler_params=pltpu.CompilerParams(
            dimension_semantics=dims,
            vmem_limit_bytes=vmem_limit),
        cost_estimate=cost,
    )(qp, kp, vp, bias)

    return out[:bz, :q_len, :v_dim]


# ---------------------------------------------------------------------------
# Self-test
# ---------------------------------------------------------------------------
def _reference(q, k, v, mask, scale):
    s = jnp.einsum("bqd,bkd->bqk", q, k) * scale
    if mask is not None:
        s = jnp.where(mask[:, None, :] == 0, _NEG_BIG, s)
    w = jax.nn.softmax(s, axis=-1)
    return jnp.einsum("bqk,bkd->bqd", w, v)


if __name__ == "__main__":
    # Primary shapes consistent with the module's forward contract.
    bz, q_len, k_len, dim = 2, 8, 8, 32
    scale = 1.0 / math.sqrt(dim)

    key = jax.random.PRNGKey(0)
    kq, kk, kv = jax.random.split(key, 3)
    q = jax.random.normal(kq, (bz, q_len, dim), dtype=jnp.float32)
    k = jax.random.normal(kk, (bz, k_len, dim), dtype=jnp.float32)
    v = jax.random.normal(kv, (bz, k_len, dim), dtype=jnp.float32)
    # mask: 1 = valid token, 0 = padding (last two keys of batch 1 are padded)
    mask = jnp.ones((bz, k_len), dtype=jnp.int32).at[1, -2:].set(0)

    ref = _reference(q, k, v, mask, scale)

    # Exact-dtype path (f32 MXU), tight tolerance.
    out_f32 = jax.block_until_ready(
        dot_product_attention(q, k, v, mask, use_bf16_matmul=False))
    assert out_f32.shape == (bz, q_len, dim)
    assert jnp.allclose(out_f32, ref, atol=2e-3, rtol=2e-3), float(
        jnp.max(jnp.abs(out_f32 - ref)))

    # Default fast path (bf16 MXU contractions, f32 accumulation), looser tolerance.
    out_bf = jax.block_until_ready(dot_product_attention(q, k, v, mask))
    assert out_bf.shape == (bz, q_len, dim)
    assert jnp.allclose(out_bf, ref, atol=5e-2, rtol=5e-2), float(
        jnp.max(jnp.abs(out_bf - ref)))

    # Longer-k shape to exercise the multi-k-tile online-softmax (flash) path.
    bz2, q_len2, k_len2 = 2, 16, 600
    k2q, k2k, k2v = jax.random.split(jax.random.PRNGKey(0), 3)
    q2 = jax.random.normal(k2q, (bz2, q_len2, dim), dtype=jnp.float32)
    k2 = jax.random.normal(k2k, (bz2, k_len2, dim), dtype=jnp.float32)
    v2 = jax.random.normal(k2v, (bz2, k_len2, dim), dtype=jnp.float32)
    mask2 = jnp.ones((bz2, k_len2), dtype=jnp.int32).at[0, -37:].set(0)
    ref2 = _reference(q2, k2, v2, mask2, scale)
    out2 = jax.block_until_ready(
        dot_product_attention(q2, k2, v2, mask2, use_bf16_matmul=False))
    assert out2.shape == (bz2, q_len2, dim)
    assert jnp.allclose(out2, ref2, atol=2e-3, rtol=2e-3), float(
        jnp.max(jnp.abs(out2 - ref2)))

    print("KERNEL_OK")
</pallas_src>

<mosaic_0001>
module attributes {stable_mosaic.version = 11 : i64} {
  func.func @_attention_single_kernel(%arg0: i32, %arg1: i32, %arg2: memref<1x8x32xf32, #tpu.memory_space<vmem>>, %arg3: memref<1x128x32xf32, #tpu.memory_space<vmem>>, %arg4: memref<1x128x32xf32, #tpu.memory_space<vmem>>, %arg5: memref<1x1x128xf32, #tpu.memory_space<vmem>>, %arg6: memref<1x8x32xf32, #tpu.memory_space<vmem>>) attributes {dimension_semantics = [#tpu.dimension_semantics<parallel>, #tpu.dimension_semantics<parallel>], iteration_bounds = array<i64: 2, 1>, scalar_prefetch = 0 : i64, scratch_operands = 0 : i64, tpu.core_type = #tpu.core_type<tc>, window_params = [{transform_indices = @transform_0, window_bounds = array<i64: 1, 8, 32>}, {transform_indices = @transform_1, window_bounds = array<i64: 1, 128, 32>}, {transform_indices = @transform_2, window_bounds = array<i64: 1, 128, 32>}, {transform_indices = @transform_3, window_bounds = array<i64: 1, 1, 128>}, {transform_indices = @transform_4, window_bounds = array<i64: 1, 8, 32>}]} {
    %c0 = arith.constant 0 : index
    %c0_0 = arith.constant 0 : index
    %c0_1 = arith.constant 0 : index
    %0 = vector.load %arg2[%c0, %c0_0, %c0_1] : memref<1x8x32xf32, #tpu.memory_space<vmem>>, vector<1x8x32xf32>
    %cst = arith.constant 0.176776692 : f32
    %1 = vector.broadcast %cst : f32 to vector<1x8x32xf32>
    %2 = arith.mulf %0, %1 : vector<1x8x32xf32>
    %c0_2 = arith.constant 0 : index
    %c0_3 = arith.constant 0 : index
    %c0_4 = arith.constant 0 : index
    %3 = vector.load %arg3[%c0_2, %c0_3, %c0_4] : memref<1x128x32xf32, #tpu.memory_space<vmem>>, vector<1x128x32xf32>
    "tpu.trace_start"() <{level = 10 : i32, message = "bqd,bkd->bqk"}> : () -> ()
    %cst_5 = arith.constant dense<0.000000e+00> : vector<1x8x128xf32>
    %4 = tpu.matmul %2, %3, %cst_5 {dimension_numbers = #tpu.dot_dimension_numbers<[2], [2], [1], [1], [0, 0, 0, 1, 1, 1], [0], [0]>} : vector<1x8x32xf32>, vector<1x128x32xf32>, vector<1x8x128xf32> -> vector<1x8x128xf32>
    "tpu.trace_stop"() : () -> ()
    %c0_6 = arith.constant 0 : index
    %c0_7 = arith.constant 0 : index
    %c0_8 = arith.constant 0 : index
    %5 = vector.load %arg5[%c0_6, %c0_7, %c0_8] : memref<1x1x128xf32, #tpu.memory_space<vmem>>, vector<1x1x128xf32>
    %6 = vector.broadcast %5 : vector<1x1x128xf32> to vector<1x8x128xf32>
    %7 = arith.addf %4, %6 : vector<1x8x128xf32>
    %cst_9 = arith.constant dense<0xFF800000> : vector<1x8xf32>
    %8 = vector.multi_reduction <maximumf>, %7, %cst_9 [2] : vector<1x8x128xf32> to vector<1x8xf32>
    %9 = vector.shape_cast %8 : vector<1x8xf32> to vector<1x8x1xf32>
    %10 = vector.broadcast %9 : vector<1x8x1xf32> to vector<1x8x128xf32>
    %11 = arith.subf %7, %10 : vector<1x8x128xf32>
    %12 = math.exp %11 : vector<1x8x128xf32>
    %cst_10 = arith.constant dense<0.000000e+00> : vector<1x8xf32>
    %13 = vector.multi_reduction <add>, %12, %cst_10 [2] : vector<1x8x128xf32> to vector<1x8xf32>
    %14 = vector.shape_cast %13 : vector<1x8xf32> to vector<1x8x1xf32>
    %15 = tpu.reciprocal %14 {approx = true} : vector<1x8x1xf32> -> vector<1x8x1xf32>
    %16 = arith.mulf %14, %15 : vector<1x8x1xf32>
    %cst_11 = arith.constant 2.000000e+00 : f32
    %17 = vector.broadcast %cst_11 : f32 to vector<1x8x1xf32>
    %18 = arith.subf %17, %16 : vector<1x8x1xf32>
    %19 = arith.mulf %15, %18 : vector<1x8x1xf32>
    %c0_12 = arith.constant 0 : index
    %c0_13 = arith.constant 0 : index
    %c0_14 = arith.constant 0 : index
    %20 = vector.load %arg4[%c0_12, %c0_13, %c0_14] : memref<1x128x32xf32, #tpu.memory_space<vmem>>, vector<1x128x32xf32>
    "tpu.trace_start"() <{level = 10 : i32, message = "bqk,bkd->bqd"}> : () -> ()
    %cst_15 = arith.constant dense<0.000000e+00> : vector<1x8x32xf32>
    %21 = tpu.matmul %12, %20, %cst_15 {dimension_numbers = #tpu.dot_dimension_numbers<[2], [1], [1], [2], [0, 0, 0, 1, 1, 2], [0], [0]>} : vector<1x8x128xf32>, vector<1x128x32xf32>, vector<1x8x32xf32> -> vector<1x8x32xf32>
    "tpu.trace_stop"() : () -> ()
    %22 = vector.broadcast %19 : vector<1x8x1xf32> to vector<1x8x32xf32>
    %23 = arith.mulf %21, %22 : vector<1x8x32xf32>
    %c0_16 = arith.constant 0 : index
    %c0_17 = arith.constant 0 : index
    %c0_18 = arith.constant 0 : index
    %24 = vector.load %arg6[%c0_16, %c0_17, %c0_18] : memref<1x8x32xf32, #tpu.memory_space<vmem>>, vector<1x8x32xf32>
    tpu.vector_store %arg6[%c0_16, %c0_17, %c0_18], %23 {strides = array<i32>} : memref<1x8x32xf32, #tpu.memory_space<vmem>>, vector<1x8x32xf32>,
    return
  }
  func.func @transform_0(%arg0: i32, %arg1: i32) -> (i32, i32, i32) {
    %c0_i32 = arith.constant 0 : i32
    %c0_i32_0 = arith.constant 0 : i32
    return %arg0, %arg1, %c0_i32 : i32, i32, i32
  }
  func.func @transform_1(%arg0: i32, %arg1: i32) -> (i32, i32, i32) {
    %c0_i32 = arith.constant 0 : i32
    %c0_i32_0 = arith.constant 0 : i32
    %c0_i32_1 = arith.constant 0 : i32
    return %arg0, %c0_i32, %c0_i32_0 : i32, i32, i32
  }
  func.func @transform_2(%arg0: i32, %arg1: i32) -> (i32, i32, i32) {
    %c0_i32 = arith.constant 0 : i32
    %c0_i32_0 = arith.constant 0 : i32
    %c0_i32_1 = arith.constant 0 : i32
    return %arg0, %c0_i32, %c0_i32_0 : i32, i32, i32
  }
  func.func @transform_3(%arg0: i32, %arg1: i32) -> (i32, i32, i32) {
    %c0_i32 = arith.constant 0 : i32
    %c0_i32_0 = arith.constant 0 : i32
    %c0_i32_1 = arith.constant 0 : i32
    return %arg0, %c0_i32, %c0_i32_0 : i32, i32, i32
  }
  func.func @transform_4(%arg0: i32, %arg1: i32) -> (i32, i32, i32) {
    %c0_i32 = arith.constant 0 : i32
    %c0_i32_0 = arith.constant 0 : i32
    return %arg0, %arg1, %c0_i32 : i32, i32, i32
  }
}

</mosaic_0001>

<bundles_post_ra>
// kernel: tpu_custom_call.1
= control target key start
LH: loop header
LB: loop body
LE: loop exit
PB: predicated region body
PF: predicated region fallthrough
CT: control target
= control target key end

     0   :  { %9 = vsyncpa [#allocation3], 0  ;;  %s909_s0 = inlined_call_operand.vmem [shape: f32[2,8,32], index: 0, kind: input, shape index: {}]   ;;  %s910_s1 = inlined_call_operand.vmem [shape: f32[2,128,32], index: 1, kind: input, shape index: {}]   ;;  %s911_s2 = inlined_call_operand.vmem [shape: f32[2,128,32], index: 2, kind: input, shape index: {}]   ;;  %s912_s3 = inlined_call_operand.vmem [shape: f32[2,1,128], index: 3, kind: input, shape index: {}]   ;;  %s913_s4 = inlined_call_operand.hbm [shape: f32[2,8,32], index: 4, kind: output, shape index: {}]  }
   0x1   :  { %11 = vsyncpa [#allocation3 + $0x1], 0  ;;  %s735_s15 = smov 0   ;;  %s737_s16 = smov 0  }
   0x2   :  { %s739_s17 = smov 0   ;;  %s741_s18 = smov 0  }
   0x3   :  { %s743_s19 = smov 0   ;;  %s745_s20 = smov 0  }
   0x4 LB: > { %s536_s21 = sadd.s32 4294967295, %s708_s20   ;;  %s537_s22 = sadd.s32 4294967294, %s708_s20   ;;  %s708_s20 = sphi %s745_s20, %s17_s20   ;;  %s704_s19 = sphi %s743_s19, %s920_s19   ;;  %s700_s18 = sphi %s741_s18, %s919_s18   ;;  %s696_s17 = sphi %s739_s17, %s918_s17   ;;  %s692_s16 = sphi %s737_s16, %s917_s16   ;;  %s688_s15 = sphi %s735_s15, %s916_s15  }
   0x5   : > { %s29_s23 = sadd.s32 1, %s704_s19  ;;  %s144_s24 = sadd.s32 1, %s696_s17 }
   0x6   : > { %p31_p0 = scmp.ge.s32.totalorder %s29_s23, 2  ;;  %p154_p1 = scmp.ne.s32.totalorder %s696_s17, %s692_s16 }
   0x7   : > { %p155_p2 = scmp.eq.s32.totalorder %s536_s21, 1  ;;  %p160_p3 = scmp.ne.s32.totalorder %s692_s16, %s688_s15 }
   0x8   : > { %s922_s23 = smov (%p31_p0, %s29_s23), 0  ;;  %p161_p5 = scmp.eq.s32.totalorder %s537_s22, 1 }
   0x9   : > { %p775_p4 = por %p155_p2, %p154_p1  ;;  %s139_s26 = ssub.s32 %s704_s19, %s922_s23 }
   0xa   : > { %p540_p6 = scmp.ge.s32.totalorder %s708_s20, 1  ;;  %p142_p7 = scmp.eq.s32.totalorder %s139_s26, 0 }
   0xb   : > { %p782_p8 = por %p161_p5, %p160_p3  ;;  %p211_p9 = scmp.lt.s32.totalorder %s708_s20, 3 }
   0xc   : > { %s788_s28 = scalar_select %p142_p7, %s696_s17, %s144_s24  }
   0xd   : > { %p212_p10 = pnand %p540_p6, %p211_p9 }
   0xe   : > { %p252_p11 = scmp.lt.s32.totalorder (!%p212_p10), %s700_s18, 1  ;;  %s565_s6 = sshll.u32 (!%p212_p10), %s700_s18, 3 }
   0xf   : > { %215 = sbr.rel (%p212_p10) target bundleno = 477 (0x1dd), region = 36  ;;  %s427_s9 = scalar_lea.hbm (!%p212_p10), %s913_s4, %s565_s6 }
  0x10   : > { %s431_s12 = sshll.u32 (!%p212_p10), %s427_s9, 4  ;;  %s432_s12 = int_to_ptr.hbm [resolvable:$true] %s431_s12 }
  0x14   : > { %s792_s29 = scalar_select %p252_p11, %s700_s18, 1  ;;  %vm294_vm0 = vcmask 261120  }
  0x15   : > { %s644_s18 = sshra.s32 %s432_s12, 4  ;;  %s645_s18 = int_to_ptr.hbm [resolvable:$true] %s644_s18 }
  0x16   : > { %s568_s30 = sshll.u32 %s792_s29, 7  ;;  %s271_s10 = scalar_lea.vmem %s912_s3, %s792_s29 }
  0x17   : > { %s800_s7 = scalar_lea.vmem %s910_s1, %s568_s30  ;;  %s542_s11 = sshll.u32 %s792_s29, 3  ;;  %v625_v28 = vld [vmem:[%s271_s10] ss:$0 sm:$0xff] }
  0x18   : > { %v289_v0 = vld [vmem:[%s800_s7 + $0x78] sm:$0xff]  ;;  %v288_v1 = vld [vmem:[%s800_s7 + $0x70] sm:$0xff]  ;;  %v287_v2 = vld [vmem:[%s800_s7 + $0x68] sm:$0xff]  ;;  %s258_s14 = scalar_lea.vmem %s909_s0, %s542_s11  ;;  %s848_s24 = scalar_lea.vmem %s911_s2, %s568_s30 }
  0x19   : > { %547 = vmatpush.xpose.msk.msra.mxu0 %vm294_vm0, %v289_v0  ;;  %v286_v3 = vld [vmem:[%s800_s7 + $0x60] sm:$0xff]  ;;  %v285_v4 = vld [vmem:[%s800_s7 + $0x58] sm:$0xff]  ;;  %v284_v5 = vld [vmem:[%s800_s7 + $0x50] sm:$0xff]  ;;  %s249_s29 = sand.u32 1, %s692_s16   ;;  %p651_p1 = scmp.lt.s32.totalorder %s645_s18, %s913_s4 }
  0x1a   : > { %v283_v6 = vld [vmem:[%s800_s7 + $0x48] sm:$0xff]  ;;  %v282_v7 = vld [vmem:[%s800_s7 + $0x40] sm:$0xff]  ;;  %v281_v8 = vld [vmem:[%s800_s7 + $0x38] sm:$0xff]  ;;  %s541_s5 = sshll.u32 %s249_s29, 3  ;;  %s416_s13 = scalar_lea.sflag [#allocation3], %s249_s29 }
  0x1b   : > { %v280_v9 = vld [vmem:[%s800_s7 + $0x30] sm:$0xff]  ;;  %v279_v10 = vld [vmem:[%s800_s7 + $0x28] sm:$0xff]  ;;  %v278_v11 = vld [vmem:[%s800_s7 + $0x20] sm:$0xff]  ;;  %s251_s10 = scalar_lea.vmem [#allocation2], %s541_s5 }
  0x1c   : > { %v277_v12 = vld [vmem:[%s800_s7 + $0x18] sm:$0xff]  ;;  %v276_v13 = vld [vmem:[%s800_s7 + $0x10] sm:$0xff]  ;;  %v275_v14 = vld [vmem:[%s800_s7 + $0x8] sm:$0xff]  ;;  %s429_s11 = sshll.u32 %s251_s10, 4  ;;  %s430_s11 = int_to_ptr.vmem [resolvable:$true] %s429_s11 }
  0x1d   : > { %548 = vmatpush.xpose.msk.msra.mxu0 %vm294_vm0, %v288_v1  ;;  %v272_v15 = vld [vmem:[%s258_s14] sm:$0xff]  ;;  %v392_v18 = vld [vmem:[%s848_s24 + $0x78] sm:$0xff]  ;;  %v391_v19 = vld [vmem:[%s848_s24 + $0x70] sm:$0xff]  ;;  %s646_s14 = scalar_lea.hbm %s645_s18, 8 }
  0x1e   : > { %v274_v16 = vld [vmem:[%s800_s7] sm:$0xff]  ;;  %v273_v17 = vmul.f32 0.17677669, %v272_v15  ;;  %393 = vmatpush.msra.mxu1 %v392_v18  ;;  %v390_v20 = vld [vmem:[%s848_s24 + $0x68] sm:$0xff]  ;;  %v388_v22 = vld [vmem:[%s848_s24 + $0x58] sm:$0xff]  ;;  %p647_p12 = scmp.ne.s32.totalorder %s645_s18, %s646_s14 }
  0x1f   : > { %v389_v21 = vld [vmem:[%s848_s24 + $0x60] sm:$0xff]  ;;  %v387_v23 = vld [vmem:[%s848_s24 + $0x50] sm:$0xff]  ;;  %v386_v24 = vld [vmem:[%s848_s24 + $0x48] sm:$0xff] }
  0x20   : > { %394 = vmatpush.msra.mxu1 %v391_v19  ;;  %v385_v25 = vld [vmem:[%s848_s24 + $0x40] sm:$0xff]  ;;  %v384_v26 = vld [vmem:[%s848_s24 + $0x38] sm:$0xff]  ;;  %v383_v27 = vld [vmem:[%s848_s24 + $0x30] sm:$0xff]  ;;  %p648_p13 = pnand %p647_p12, %p775_p4 }
  0x21   : > { %549 = vmatpush.xpose.msk.msra.mxu0 %vm294_vm0, %v287_v2  ;;  %v382_v31 = vld [vmem:[%s848_s24 + $0x28] sm:$0xff]  ;;  %v381_v32 = vld [vmem:[%s848_s24 + $0x20] sm:$0xff]  ;;  %v380_v33 = vld [vmem:[%s848_s24 + $0x18] sm:$0xff] }
  0x22   : > { %395 = vmatpush.msra.mxu1 %v390_v20  ;;  %v379_v34 = vld [vmem:[%s848_s24 + $0x10] sm:$0xff]  ;;  %v378_v35 = vld [vmem:[%s848_s24 + $0x8] sm:$0xff]  ;;  %v377_v36 = vld [vmem:[%s848_s24] sm:$0xff]  ;;  %p649_p0 = pneg %p648_p13  ;;  %s650_s24 = scalar_lea.hbm %s913_s4, 16 }
  0x23   : > { %p652_p2 = scmp.lt.s32.totalorder %s650_s24, %s646_s14 }
  0x24   : > { %396 = vmatpush.msra.mxu1 %v389_v21 }
  0x25   : > { %550 = vmatpush.xpose.msk.msra.mxu0 %vm294_vm0, %v286_v3  ;;  %p653_p3 = por %p652_p2, %p651_p1 }
  0x26   : > { %397 = vmatpush.msra.mxu1 %v388_v22 }
  0x27   : > { %p654_p5 = pnand %p653_p3, %p649_p0 }
  0x28   : > { %398 = vmatpush.msra.mxu1 %v387_v23 }
  0x29   : > { %551 = vmatpush.xpose.msk.msra.mxu0 %vm294_vm0, %v285_v4 }
  0x2a   : > { %399 = vmatpush.msra.mxu1 %v386_v24 }
  0x2c   : > { %400 = vmatpush.msra.mxu1 %v385_v25 }
  0x2d   : > { %552 = vmatpush.xpose.msk.msra.mxu0 %vm294_vm0, %v284_v5 }
  0x2e   : > { %401 = vmatpush.msra.mxu1 %v384_v26 }
  0x30   : > { %402 = vmatpush.msra.mxu1 %v383_v27 }
  0x31   : > { %553 = vmatpush.xpose.msk.msra.mxu0 %vm294_vm0, %v283_v6 }
  0x32   : > { %403 = vmatpush.msra.mxu1 %v382_v31 }
  0x34   : > { %404 = vmatpush.msra.mxu1 %v381_v32 }
  0x35   : > { %554 = vmatpush.xpose.msk.msra.mxu0 %vm294_vm0, %v282_v7 }
  0x36   : > { %405 = vmatpush.msra.mxu1 %v380_v33 }
  0x38   : > { %406 = vmatpush.msra.mxu1 %v379_v34 }
  0x39   : > { %555 = vmatpush.xpose.msk.msra.mxu0 %vm294_vm0, %v281_v8 }
  0x3a   : > { %407 = vmatpush.msra.mxu1 %v378_v35 }
  0x3c   : > { %408 = vmatpush.msra.mxu1 %v377_v36 }
  0x3d   : > { %556 = vmatpush.xpose.msk.msra.mxu0 %vm294_vm0, %v280_v9 }
  0x41   : > { %557 = vmatpush.xpose.msk.msra.mxu0 %vm294_vm0, %v279_v10 }
  0x45   : > { %558 = vmatpush.xpose.msk.msra.mxu0 %vm294_vm0, %v278_v11 }
  0x49   : > { %559 = vmatpush.xpose.msk.msra.mxu0 %vm294_vm0, %v277_v12 }
  0x4d   : > { %560 = vmatpush.xpose.msk.msra.mxu0 %vm294_vm0, %v276_v13 }
  0x51   : > { %561 = vmatpush.xpose.msk.msra.mxu0 %vm294_vm0, %v275_v14 }
  0x55   : > { %562 = vmatpush.xpose.msk.msra.mxu0 %vm294_vm0, %v274_v16 }
  0x58   : > { %563 = vmatmul.msk.f32.vlgmr.msra.gmra.mxu0 %vm294_vm0, %v273_v17 }
  0xd5   : > { %v363_v29 = vpop.f32.mrf.mxu0 }
  0xd6   : > { %v364_v30 = vadd.f32 %v625_v28, %v363_v29 }
  0xd8   : > { %366 = vmax.xlane.f32.xlu0 %v364_v30 }
 0x14b   : > { %v367_v37 = vpop.xlane.xlu0 %366 }
 0x14c   : > { %v368_v38 = vsub.f32 %v364_v30, %v367_v37 }
 0x14e   : > { %v369_v39 = vmul.f32 1.442695, %v368_v38 }
 0x150   : > { %626 = vpow2.f32 %v369_v39 }
 0x156   : > { %v627_v40 = vpop.eup %626 }
 0x157   : > { %371 = vadd.xlane.f32.xlu0 %v627_v40  ;;  %409 = vmatmul.f32.vlgmr.msra.gmra.mxu1 %v627_v40 }
 0x1ca   : > { %v372_v41 = vpop.xlane.xlu0 %371 }
 0x1cb   : > { %628 = vrcp.f32 %v372_v41 }
 0x1d1   : > { %v629_v42 = vpop.eup %628 }
 0x1d2   : > { %v374_v43 = vmul.f32 %v629_v42, %v372_v41 }
 0x1d4   : > { %v375_v44 = vsub.f32 2.0, %v374_v43  ;;  %v410_v46 = vpop.f32.mrf.mxu1 }
 0x1d6   : > { %v376_v45 = vmul.f32 %v629_v42, %v375_v44 }
 0x1d8   : > { %v413_v47 = vmul.f32 %v410_v46, %v376_v45 }
 0x1da   : > { %414 = vst.msk [vmem:[%s251_s10] sm:$0xff] %vm294_vm0, %v413_v47 }
 0x1db   : > { %657 = shalt.err (!%p654_p5)
}
 0x1dc   : > { %570 = dma.vmem_to_hbm [thread:$0]  (%p775_p4), %s430_s11, 128, %s432_s12, %s416_s13  }
 0x1dd PF: > { %p576_p6 = scmp.ge.s32.totalorder %s708_s20, 2  ;;  %s443_s29 = sand.u32 1, %s688_s15  }
 0x1de   : > { %s444_s5 = scalar_lea.sflag [#allocation3], %s443_s29 }
 0x1df   : > { %p573_p7 = pnand %p576_p6, %p782_p8 }
 0x1e1   : > { %p574_p9 = pneg %p573_p7 }
 0x1e3   : > { %683 = dma.done.wait (%p574_p9), %s444_s5, 128  }
 0x1e4   : > { %685 = vsyncadd (%p574_p9), %s444_s5, 4294967168  ;;  %s17_s20 = sadd.s32 1, %s708_s20   ;;  %s916_s15 = smov %s692_s16 }
 0x1e5   : > { %p14_p10 = scmp.ge.s32.totalorder %s17_s20, 4   ;;  %s917_s16 = smov %s696_s17 }
 0x1e6   : > { %s918_s17 = smov %s788_s28  ;;  %s919_s18 = smov %s704_s19 }
 0x1e7   : > { %s920_s19 = smov %s922_s23  ;;  %16 = sbr.rel (!%p14_p10) target bundleno = 4 (0x4), region = 80 }
 0x1ec   :  { %450 = vsyncpa [#allocation3], 1 }
 0x1ed   :  { %452 = vsyncpa [#allocation3 + $0x1], 1 }

</bundles_post_ra>
